<compile_context>
chip_gen: v7x
topology: tpu7x:2x2x1
jax: 0.10.0
libtpu: 0.0.40
codegen_flags: <defaults>
</compile_context>

<pallas_src>
import functools

import jax
import jax.numpy as jnp
from jax.experimental import pallas as pl
from jax.experimental.pallas import tpu as pltpu


def _ceil_to(a, b):
    return -(-a // b) * b


def _proj_kernel(h_ref, w_ref, a_ref, z_ref, sd_ref, *, ones_col):
    # (Tn, Din) @ (Din, Dpad) on the MXU over a node-row tile.
    z = jnp.dot(h_ref[...], w_ref[...], preferred_element_type=jnp.float32)
    # Plant a ones-column in the (otherwise zero) feature padding: in the attention kernel
    # the softmax denominator then falls out of the aggregation matmul (deferred normalization).
    col = jax.lax.broadcasted_iota(jnp.int32, z.shape, 1)
    z = jnp.where(col == ones_col, 1.0, z)
    z_ref[...] = z
    # Fused per-node attention logits: column 0 = z . a_src, column 1 = z . a_dst.
    # Rows >= d_out of a_ref are zero, so the planted ones-column does not perturb them.
    sd_ref[...] = jnp.dot(z, a_ref[...], preferred_element_type=jnp.float32)


def _attn_kernel(d_ref, s_ref, adj_ref, z_ref, o_ref, m_sc, acc_sc, *, ones_col):
    j = pl.program_id(1)

    @pl.when(j == 0)
    def _():
        m_sc[...] = jnp.full_like(m_sc, -jnp.inf)
        acc_sc[...] = jnp.zeros_like(acc_sc)

    adj = adj_ref[...].astype(jnp.float32)            # (Td, Ts) 0/1 mask (streamed as int8)
    e = d_ref[...] + s_ref[...]                       # (Td, 1) + (1, Ts) -> (Td, Ts)
    e = jnp.maximum(e, 0.01 * e)                      # leaky_relu (default slope), 2 VALU ops
    e = jnp.where(adj > 0.0, e, -1e30)                # mask non-edges for the running max

    m_prev = m_sc[...]
    m_new = jnp.maximum(m_prev, jnp.max(e, axis=-1, keepdims=True))
    # Unnormalized probabilities; the multiplicative mask also kills the exp(0)=1 artifact
    # of a fully-masked block (where m_new == -1e30).
    p = jnp.exp(e - m_new) * adj
    corr = jnp.exp(m_prev - m_new)

    # z carries a ones-column at `ones_col`, so this single MXU matmul also accumulates the
    # softmax denominator in that column — no full-width alpha multiply, no lane-reduce.
    acc_sc[...] = corr * acc_sc[...] + jnp.dot(p, z_ref[...],
                                               preferred_element_type=jnp.float32)
    m_sc[...] = m_new

    @pl.when(j == pl.num_programs(1) - 1)
    def _():
        acc = acc_sc[...]
        l = acc[:, ones_col:ones_col + 1]
        inv = pl.reciprocal(l + 1e-20, approx=True)   # EUP rcp; zero-in-degree rows stay 0
        o_ref[...] = acc * inv


def gat_forward(h, adj, w_fc, w_attn):
    """GATLayer forward.

    h:      (N, in_dim) float32   node features
    adj:    (N, N) int8/bool      adj[dst, src] != 0 iff edge src -> dst
    w_fc:   (in_dim, out_dim)     fc weight, already transposed (z = h @ w_fc)
    w_attn: (1, 2*out_dim)        attn_fc weight; first half -> src z, second half -> dst z
    returns (N, out_dim)
    """
    N, d_in = h.shape
    d_out = w_fc.shape[1]

    # Pad the feature dim so z / output blocks are lane-dense (multiple of 128), with at least
    # one spare column reserved for the softmax-denominator ones-column.
    d_pad = _ceil_to(d_out + 1, 128)
    ones_col = d_out

    # Node-axis tiling: flash-style (dst, src) grid bounds VMEM independently of N.
    if N <= 128:
        n_pad = 128
        tile_d = tile_s = 128
    else:
        n_pad = _ceil_to(N, 256)
        tile_d = 256
        tile_s = 512 if n_pad % 512 == 0 else 256
    tile_p = tile_s                                    # projection-kernel row tile

    h_p = jnp.pad(h.astype(jnp.float32), ((0, n_pad - N), (0, 0)))
    adj_i8 = jnp.pad((adj != 0).astype(jnp.int8), ((0, n_pad - N), (0, n_pad - N)))
    w_p = jnp.pad(w_fc.astype(jnp.float32), ((0, 0), (0, d_pad - d_out)))
    # (d_pad, 128): columns 0/1 hold a_src / a_dst, rest zero (lane-dense sd output).
    a_cat = jnp.zeros((d_pad, 128), jnp.float32)
    a_cat = a_cat.at[:d_out, 0].set(w_attn[0, :d_out].astype(jnp.float32))
    a_cat = a_cat.at[:d_out, 1].set(w_attn[0, d_out:].astype(jnp.float32))

    cparams1 = pltpu.CompilerParams(dimension_semantics=("parallel",))
    cparams2 = pltpu.CompilerParams(dimension_semantics=("parallel", "arbitrary"))

    # ---- kernel 1: z = h @ W (padded, ones-column planted) + fused per-node logits ----
    z, sd = pl.pallas_call(
        functools.partial(_proj_kernel, ones_col=ones_col),
        out_shape=(jax.ShapeDtypeStruct((n_pad, d_pad), jnp.float32),
                   jax.ShapeDtypeStruct((n_pad, 128), jnp.float32)),
        grid_spec=pltpu.PrefetchScalarGridSpec(
            num_scalar_prefetch=0,
            grid=(n_pad // tile_p,),
            in_specs=[pl.BlockSpec((tile_p, d_in), lambda i: (i, 0)),
                      pl.BlockSpec((d_in, d_pad), lambda i: (0, 0)),
                      pl.BlockSpec((d_pad, 128), lambda i: (0, 0))],
            out_specs=[pl.BlockSpec((tile_p, d_pad), lambda i: (i, 0)),
                       pl.BlockSpec((tile_p, 128), lambda i: (i, 0))],
        ),
        compiler_params=cparams1,
    )(h_p, w_p, a_cat)

    s_row = sd[:, 0].reshape(1, n_pad)     # src-side logits: resident (1, n_pad) row
    d_col = sd[:, 1:2]                     # dst-side logits: per-tile (tile_d, 1) column

    # ---- kernel 2: flash-style masked edge softmax + aggregation over src tiles ----
    out = pl.pallas_call(
        functools.partial(_attn_kernel, ones_col=ones_col),
        out_shape=jax.ShapeDtypeStruct((n_pad, d_pad), jnp.float32),
        grid_spec=pltpu.PrefetchScalarGridSpec(
            num_scalar_prefetch=0,
            grid=(n_pad // tile_d, n_pad // tile_s),
            in_specs=[pl.BlockSpec((tile_d, 1), lambda i, j: (i, 0)),       # dst logits
                      pl.BlockSpec((1, tile_s), lambda i, j: (0, j)),       # src logits
                      pl.BlockSpec((tile_d, tile_s), lambda i, j: (i, j)),  # int8 adjacency
                      pl.BlockSpec((tile_s, d_pad), lambda i, j: (j, 0))],  # src features
            out_specs=pl.BlockSpec((tile_d, d_pad), lambda i, j: (i, 0)),
            scratch_shapes=[pltpu.VMEM((tile_d, 1), jnp.float32),     # running max
                            pltpu.VMEM((tile_d, d_pad), jnp.float32)],  # acc (+ denom column)
        ),
        compiler_params=cparams2,
    )(d_col, s_row, adj_i8, z)

    return out[:N, :d_out]


def reference_forward(h, adj_bool, w_fc, w_attn):
    """Pure-JAX reference mirroring the PyTorch/DGL GATLayer forward."""
    d_out = w_fc.shape[1]
    z = h @ w_fc                                   # (N, Dout)
    s = z @ w_attn[0, :d_out]                      # (N,)  src-side logits
    d = z @ w_attn[0, d_out:]                      # (N,)  dst-side logits
    e = d[:, None] + s[None, :]                    # e[dst, src]
    e = jnp.where(e >= 0.0, e, 0.01 * e)           # leaky_relu
    e = jnp.where(adj_bool, e, -jnp.inf)
    alpha = jax.nn.softmax(e, axis=-1)
    return alpha @ z


def _xavier_normal(key, shape_out_in, gain):
    fan_out, fan_in = shape_out_in
    std = gain * (2.0 / (fan_in + fan_out)) ** 0.5
    return std * jax.random.normal(key, shape_out_in, jnp.float32)


if __name__ == "__main__":
    N = 8          # number of graph nodes
    IN_DIM = 128
    OUT_DIM = 64

    key = jax.random.PRNGKey(0)
    k_h, k_fc, k_attn, k_adj = jax.random.split(key, 4)

    h = jax.random.normal(k_h, (N, IN_DIM), jnp.float32)

    # random graph + a ring so every node has at least one incoming edge
    adj_b = jax.random.uniform(k_adj, (N, N)) < 0.3
    ring = jnp.roll(jnp.eye(N, dtype=bool), 1, axis=1)   # edge (i+1)%N -> i
    adj_b = adj_b | ring

    gain = 2.0 ** 0.5                                    # nn.init.calculate_gain('relu')
    w_fc = _xavier_normal(k_fc, (OUT_DIM, IN_DIM), gain).T      # (in, out) for the kernel
    w_attn = _xavier_normal(k_attn, (1, 2 * OUT_DIM), gain)

    out = jax.block_until_ready(gat_forward(h, adj_b.astype(jnp.int8), w_fc, w_attn))
    ref = jax.block_until_ready(reference_forward(h, adj_b, w_fc, w_attn))

    assert out.shape == (N, OUT_DIM), out.shape
    err = float(jnp.max(jnp.abs(out - ref)))
    assert jnp.allclose(out, ref, rtol=2e-3, atol=2e-3), err

    print("KERNEL_OK")
</pallas_src>

<mosaic_0001>
module attributes {stable_mosaic.version = 11 : i64} {
  func.func @_proj_kernel(%arg0: i32, %arg1: memref<128x128xf32, #tpu.memory_space<vmem>>, %arg2: memref<128x128xf32, #tpu.memory_space<vmem>>, %arg3: memref<128x128xf32, #tpu.memory_space<vmem>>, %arg4: memref<128x128xf32, #tpu.memory_space<vmem>>, %arg5: memref<128x128xf32, #tpu.memory_space<vmem>>) attributes {dimension_semantics = [#tpu.dimension_semantics<parallel>], iteration_bounds = array<i64: 1>, scalar_prefetch = 0 : i64, scratch_operands = 0 : i64, tpu.core_type = #tpu.core_type<tc>, window_params = [{transform_indices = @transform_0, window_bounds = array<i64: 128, 128>}, {pipeline_mode = #tpu.pipeline_mode<synchronous>, transform_indices = @transform_1, window_bounds = array<i64: 128, 128>}, {pipeline_mode = #tpu.pipeline_mode<synchronous>, transform_indices = @transform_2, window_bounds = array<i64: 128, 128>}, {transform_indices = @transform_3, window_bounds = array<i64: 128, 128>}, {transform_indices = @transform_4, window_bounds = array<i64: 128, 128>}]} {
    %c0 = arith.constant 0 : index
    %c0_0 = arith.constant 0 : index
    %0 = vector.load %arg1[%c0, %c0_0] : memref<128x128xf32, #tpu.memory_space<vmem>>, vector<128x128xf32>
    %c0_1 = arith.constant 0 : index
    %c0_2 = arith.constant 0 : index
    %1 = vector.load %arg2[%c0_1, %c0_2] : memref<128x128xf32, #tpu.memory_space<vmem>>, vector<128x128xf32>
    %cst = arith.constant dense<0.000000e+00> : vector<128x128xf32>
    %2 = tpu.matmul %0, %1, %cst {dimension_numbers = #tpu.dot_dimension_numbers<[1], [0], [0], [1], [0, 0, 1, 1], [], []>} : vector<128x128xf32>, vector<128x128xf32>, vector<128x128xf32> -> vector<128x128xf32>
    %3 = tpu.iota {dimensions = array<i32: 1>} : vector<128x128xi32>
    %c64_i32 = arith.constant 64 : i32
    %4 = vector.broadcast %c64_i32 : i32 to vector<128x128xi32>
    %5 = arith.cmpi eq, %3, %4 : vector<128x128xi32>
    %cst_3 = arith.constant 1.000000e+00 : f32
    %6 = vector.broadcast %cst_3 : f32 to vector<128x128xf32>
    %7 = arith.select %5, %6, %2 : vector<128x128xi1>, vector<128x128xf32>
    %c0_4 = arith.constant 0 : index
    %c0_5 = arith.constant 0 : index
    %8 = vector.load %arg4[%c0_4, %c0_5] : memref<128x128xf32, #tpu.memory_space<vmem>>, vector<128x128xf32>
    tpu.vector_store %arg4[%c0_4, %c0_5], %7 {strides = array<i32>} : memref<128x128xf32, #tpu.memory_space<vmem>>, vector<128x128xf32>,
    %c0_6 = arith.constant 0 : index
    %c0_7 = arith.constant 0 : index
    %9 = vector.load %arg3[%c0_6, %c0_7] : memref<128x128xf32, #tpu.memory_space<vmem>>, vector<128x128xf32>
    %cst_8 = arith.constant dense<0.000000e+00> : vector<128x128xf32>
    %10 = tpu.matmul %7, %9, %cst_8 {dimension_numbers = #tpu.dot_dimension_numbers<[1], [0], [0], [1], [0, 0, 1, 1], [], []>} : vector<128x128xf32>, vector<128x128xf32>, vector<128x128xf32> -> vector<128x128xf32>
    %c0_9 = arith.constant 0 : index
    %c0_10 = arith.constant 0 : index
    %11 = vector.load %arg5[%c0_9, %c0_10] : memref<128x128xf32, #tpu.memory_space<vmem>>, vector<128x128xf32>
    tpu.vector_store %arg5[%c0_9, %c0_10], %10 {strides = array<i32>} : memref<128x128xf32, #tpu.memory_space<vmem>>, vector<128x128xf32>,
    return
  }
  func.func @transform_0(%arg0: i32) -> (i32, i32) {
    %c0_i32 = arith.constant 0 : i32
    %c0_i32_0 = arith.constant 0 : i32
    return %arg0, %c0_i32 : i32, i32
  }
  func.func @transform_1(%arg0: i32) -> (i32, i32) {
    %c0_i32 = arith.constant 0 : i32
    %c0_i32_0 = arith.constant 0 : i32
    %c0_i32_1 = arith.constant 0 : i32
    return %c0_i32, %c0_i32_0 : i32, i32
  }
  func.func @transform_2(%arg0: i32) -> (i32, i32) {
    %c0_i32 = arith.constant 0 : i32
    %c0_i32_0 = arith.constant 0 : i32
    %c0_i32_1 = arith.constant 0 : i32
    return %c0_i32, %c0_i32_0 : i32, i32
  }
  func.func @transform_3(%arg0: i32) -> (i32, i32) {
    %c0_i32 = arith.constant 0 : i32
    %c0_i32_0 = arith.constant 0 : i32
    return %arg0, %c0_i32 : i32, i32
  }
  func.func @transform_4(%arg0: i32) -> (i32, i32) {
    %c0_i32 = arith.constant 0 : i32
    %c0_i32_0 = arith.constant 0 : i32
    return %arg0, %c0_i32 : i32, i32
  }
}

</mosaic_0001>

<bundles_post_ra>
// kernel: tpu_custom_call.1
= control target key start
LH: loop header
LB: loop body
LE: loop exit
PB: predicated region body
PF: predicated region fallthrough
CT: control target
= control target key end

     0   :  { %10 = vsyncpa [#allocation3], 0  ;;  %s996_s0 = inlined_call_operand.hbm [shape: f32[128,128], index: 0, kind: input, shape index: {}]   ;;  %s997_s1 = inlined_call_operand.hbm [shape: f32[128,128], index: 1, kind: input, shape index: {}]   ;;  %s998_s2 = inlined_call_operand.hbm [shape: f32[128,128], index: 2, kind: input, shape index: {}]   ;;  %s999_s3 = inlined_call_operand.hbm [shape: f32[128,128], index: 3, kind: output, shape index: {0}]   ;;  %s1000_s4 = inlined_call_operand.hbm [shape: f32[128,128], index: 4, kind: output, shape index: {1}]  }
   0x1   :  { %11 = vsyncpa [#allocation6], 0 }
   0x2   :  { %12 = vsyncpa [#allocation4], 0 }
   0x3   :  { %13 = vsyncpa [#allocation10], 0  ;;  %s847_s15 = smov [#allocation5]   ;;  %s848_s17 = smov [#allocation2]  }
   0x4   :  { %s31_s16 = sshll.u32 %s847_s15, 4  ;;  %s19_s18 = sshll.u32 %s848_s17, 4  ;;  %s32_s16 = int_to_ptr.vmem [resolvable:$true] %s31_s16  ;;  %s879_s18 = int_to_ptr.vmem [resolvable:$true] %s19_s18 }
   0x5   :  { %s729_s21 = scalar_lea.hbm %s997_s1, 2048 }
   0x6   :  { %p730_p0 = scmp.ne.s32.totalorder %s997_s1, %s729_s21  ;;  %p733_p1 = scmp.lt.u32.totalorder %s729_s21, %s997_s1 }
   0x8   :  { %p735_p2 = pnand %p733_p1, %p730_p0 }
   0xa   :  { %738 = shalt.err (!%p735_p2)
}
   0xb   :  { %s739_s26 = scalar_lea.vmem %s32_s16, 2048  ;;  %p744_p4 = scmp.lt.s32.totalorder %s32_s16, %s32_s16 }
   0xc   :  { %p740_p3 = scmp.ne.s32.totalorder %s32_s16, %s739_s26  ;;  %p745_p5 = scmp.lt.s32.totalorder %s739_s26, %s739_s26 }
   0xe   :  { %p746_p6 = por %p745_p5, %p744_p4 }
  0x10   :  { %p747_p7 = pnand %p746_p6, %p740_p3 }
  0x12   :  { %750 = shalt.err (!%p747_p7)
}
  0x13   :  { %s849_s27 = smov 128   ;;  %s850_s28 = smov 8  }
  0x14   :  { %37 = dma.hbm_to_vmem [thread:$0]  %s997_s1, 2048, %s32_s16, [#allocation6], %s849_s27, %s849_s27, %s850_s28  }
  0x15   :  { %s751_s7 = scalar_lea.hbm %s996_s0, 2048 }
  0x16   :  { %p752_p8 = scmp.ne.s32.totalorder %s996_s0, %s751_s7  ;;  %p755_p9 = scmp.lt.u32.totalorder %s751_s7, %s996_s0 }
  0x18   :  { %p757_p10 = pnand %p755_p9, %p752_p8 }
  0x1a   :  { %760 = shalt.err (!%p757_p10)
}
  0x1b   :  { %s761_s12 = scalar_lea.vmem %s879_s18, 2048  ;;  %p766_p12 = scmp.lt.s32.totalorder %s879_s18, %s879_s18 }
  0x1c   :  { %p762_p11 = scmp.ne.s32.totalorder %s879_s18, %s761_s12  ;;  %p767_p13 = scmp.lt.s32.totalorder %s761_s12, %s761_s12 }
  0x1e   :  { %p768_p0 = por %p767_p13, %p766_p12 }
  0x20   :  { %p769_p1 = pnand %p768_p0, %p762_p11 }
  0x22   :  { %772 = shalt.err (!%p769_p1)
}
  0x23   :  { %25 = dma.hbm_to_vmem [thread:$0]  %s996_s0, 2048, %s879_s18, [#allocation3], %s849_s27, %s849_s27, %s850_s28  }
  0x24   :  { %s851_s14 = smov [#allocation7]   ;;  %s773_s19 = scalar_lea.hbm %s998_s2, 2048 }
  0x25   :  { %s43_s15 = sshll.u32 %s851_s14, 4  ;;  %p774_p2 = scmp.ne.s32.totalorder %s998_s2, %s773_s19  ;;  %s44_s15 = int_to_ptr.vmem [resolvable:$true] %s43_s15 }
  0x26   :  { %p777_p3 = scmp.lt.u32.totalorder %s773_s19, %s998_s2 }
  0x28   :  { %p779_p4 = pnand %p777_p3, %p774_p2 }
  0x2a   :  { %782 = shalt.err (!%p779_p4)
}
  0x2b   :  { %s783_s24 = scalar_lea.vmem %s44_s15, 2048  ;;  %p788_p6 = scmp.lt.s32.totalorder %s44_s15, %s44_s15 }
  0x2c   :  { %p784_p5 = scmp.ne.s32.totalorder %s44_s15, %s783_s24  ;;  %p789_p7 = scmp.lt.s32.totalorder %s783_s24, %s783_s24 }
  0x2e   :  { %p790_p8 = por %p789_p7, %p788_p6 }
  0x30   :  { %p791_p9 = pnand %p790_p8, %p784_p5 }
  0x32   :  { %794 = shalt.err (!%p791_p9)
}
  0x33   :  { %49 = dma.hbm_to_vmem [thread:$0]  %s998_s2, 2048, %s44_s15, [#allocation6], %s849_s27, %s849_s27, %s850_s28  }
  0x34   :  { %839 = dma.done.wait [#allocation3], 2048  }
  0x35   :  { %840 = vsyncadd [#allocation3], 4294965248 }
  0x36   :  { %841 = dma.done.wait [#allocation6], 4096  }
  0x37   :  { %842 = vsyncadd [#allocation6], 4294963200  ;;  %v75_v0 = vld [vmem:[#allocation5] sm:$0xff]  ;;  %v76_v1 = vld [vmem:[#allocation5 + $0x8] sm:$0xff]  ;;  %s852_s2 = smov [#allocation8]  }
  0x38   :  { %v77_v2 = vld [vmem:[#allocation5 + $0x10] sm:$0xff]  ;;  %v658_v3 = vpack.c.bf16 %v76_v1, %v75_v0  ;;  %v78_v4 = vld [vmem:[#allocation5 + $0x18] sm:$0xff]  ;;  %v79_v6 = vld [vmem:[#allocation5 + $0x20] sm:$0xff]  ;;  %v236_v0 = vlaneseq  ;;  %s453_s25 = sshll.u32 %s852_s2, 4  ;;  %s454_s25 = int_to_ptr.vmem [resolvable:$true] %s453_s25 }
  0x39   :  { %v662_v5 = vpack.c.bf16 %v78_v4, %v77_v2  ;;  %v80_v7 = vld [vmem:[#allocation5 + $0x28] sm:$0xff]  ;;  %v59_v9 = vld [vmem:[#allocation2] sm:$0xff]  ;;  %v81_v10 = vld [vmem:[#allocation5 + $0x30] sm:$0xff]  ;;  %s795_s26 = scalar_lea.vmem %s454_s25, 2048  ;;  %p800_p11 = scmp.lt.s32.totalorder %s454_s25, %s454_s25 }
  0x3a   :  { %659 = vmatprep.subr.bf16.mxu0 %v658_v3  ;;  %v666_v8 = vpack.c.bf16 %v80_v7, %v79_v6  ;;  %v82_v11 = vld [vmem:[#allocation5 + $0x38] sm:$0xff]  ;;  %578 = vmatprep.mubr.f32.mxu0 %v59_v9  ;;  %v83_v13 = vld [vmem:[#allocation5 + $0x40] sm:$0xff]  ;;  %v84_v14 = vld [vmem:[#allocation5 + $0x48] sm:$0xff]  ;;  %v931_v1 = vand.u32 127, %v236_v0  ;;  %p796_p10 = scmp.ne.s32.totalorder %s454_s25, %s795_s26  ;;  %p801_p12 = scmp.lt.s32.totalorder %s795_s26, %s795_s26 }
  0x3b   :  { %661 = vmatpush3.bf16.msra.mxu0 %v658_v3  ;;  %v670_v12 = vpack.c.bf16 %v82_v11, %v81_v10  ;;  %v271_v15 = vld [vmem:[#allocation7] sm:$0xff]  ;;  %v272_v16 = vld [vmem:[#allocation7 + $0x8] sm:$0xff]  ;;  %v273_v17 = vld [vmem:[#allocation7 + $0x10] sm:$0xff]  ;;  %v674_v21 = vpack.c.bf16 %v84_v14, %v83_v13 }
  0x3c   :  { %663 = vmatprep.subr.bf16.mxu0 %v662_v5  ;;  %v274_v18 = vld [vmem:[#allocation7 + $0x18] sm:$0xff]  ;;  %v690_v19 = vpack.c.bf16 %v272_v16, %v271_v15  ;;  %v275_v22 = vld [vmem:[#allocation7 + $0x20] sm:$0xff]  ;;  %v276_v23 = vld [vmem:[#allocation7 + $0x28] sm:$0xff]  ;;  %vm238_vm0 = vcmp.eq.s32.totalorder %v931_v1, 64  ;;  %p802_p13 = por %p801_p12, %p800_p11 }
  0x3d   :  { %v694_v20 = vpack.c.bf16 %v274_v18, %v273_v17  ;;  %v85_v24 = vld [vmem:[#allocation5 + $0x50] sm:$0xff]  ;;  %v86_v25 = vld [vmem:[#allocation5 + $0x58] sm:$0xff]  ;;  %v698_v26 = vpack.c.bf16 %v276_v23, %v275_v22  ;;  %v87_v30 = vld [vmem:[#allocation5 + $0x60] sm:$0xff] }
  0x3e   :  { %691 = vmatprep.subr.bf16.mxu1 %v690_v19  ;;  %v678_v27 = vpack.c.bf16 %v86_v25, %v85_v24  ;;  %v277_v28 = vld [vmem:[#allocation7 + $0x30] sm:$0xff]  ;;  %v278_v29 = vld [vmem:[#allocation7 + $0x38] sm:$0xff]  ;;  %v88_v31 = vld [vmem:[#allocation5 + $0x68] sm:$0xff]  ;;  %p803_p0 = pnand %p802_p13, %p796_p10 }
  0x3f   :  { %665 = vmatpush3.bf16.msra.mxu0 %v662_v5  ;;  %693 = vmatpush3.bf16.msra.mxu1 %v690_v19  ;;  %v702_v32 = vpack.c.bf16 %v278_v29, %v277_v28  ;;  %v682_v33 = vpack.c.bf16 %v88_v31, %v87_v30  ;;  %v279_v34 = vld [vmem:[#allocation7 + $0x40] sm:$0xff]  ;;  %v280_v35 = vld [vmem:[#allocation7 + $0x48] sm:$0xff]  ;;  %v89_v36 = vld [vmem:[#allocation5 + $0x70] sm:$0xff] }
  0x40   :  { %667 = vmatprep.subr.bf16.mxu0 %v666_v8  ;;  %695 = vmatprep.subr.bf16.mxu1 %v694_v20  ;;  %v90_v37 = vld [vmem:[#allocation5 + $0x78] sm:$0xff]  ;;  %v706_v38 = vpack.c.bf16 %v280_v35, %v279_v34  ;;  %v281_v40 = vld [vmem:[#allocation7 + $0x50] sm:$0xff]  ;;  %v283_v43 = vld [vmem:[#allocation7 + $0x60] sm:$0xff] }
  0x41   :  { %v686_v39 = vpack.c.bf16 %v90_v37, %v89_v36  ;;  %v282_v41 = vld [vmem:[#allocation7 + $0x58] sm:$0xff]  ;;  %v284_v44 = vld [vmem:[#allocation7 + $0x68] sm:$0xff]  ;;  %v61_v47 = vld [vmem:[#allocation2 + $0x10] sm:$0xff] }
  0x42   :  { %v710_v42 = vpack.c.bf16 %v282_v41, %v281_v40  ;;  %v60_v45 = vld [vmem:[#allocation2 + $0x8] sm:$0xff]  ;;  %v714_v46 = vpack.c.bf16 %v284_v44, %v283_v43  ;;  %v62_v48 = vld [vmem:[#allocation2 + $0x18] sm:$0xff]  ;;  %v63_v49 = vld [vmem:[#allocation2 + $0x20] sm:$0xff] }
  0x43   :  { %669 = vmatpush3.bf16.msra.mxu0 %v666_v8  ;;  %697 = vmatpush3.bf16.msra.mxu1 %v694_v20  ;;  %v64_v50 = vld [vmem:[#allocation2 + $0x28] sm:$0xff]  ;;  %v65_v51 = vld [vmem:[#allocation2 + $0x30] sm:$0xff]  ;;  %v66_v52 = vld [vmem:[#allocation2 + $0x38] sm:$0xff] }
  0x44   :  { %671 = vmatprep.subr.bf16.mxu0 %v670_v12  ;;  %699 = vmatprep.subr.bf16.mxu1 %v698_v26  ;;  %v67_v53 = vld [vmem:[#allocation2 + $0x40] sm:$0xff]  ;;  %v68_v54 = vld [vmem:[#allocation2 + $0x48] sm:$0xff]  ;;  %v69_v55 = vld [vmem:[#allocation2 + $0x50] sm:$0xff] }
  0x45   :  { %v70_v56 = vld [vmem:[#allocation2 + $0x58] sm:$0xff]  ;;  %v71_v57 = vld [vmem:[#allocation2 + $0x60] sm:$0xff]  ;;  %v72_v58 = vld [vmem:[#allocation2 + $0x68] sm:$0xff] }
  0x46   :  { %v73_v59 = vld [vmem:[#allocation2 + $0x70] sm:$0xff]  ;;  %v74_v60 = vld [vmem:[#allocation2 + $0x78] sm:$0xff] }
  0x47   :  { %673 = vmatpush3.bf16.msra.mxu0 %v670_v12  ;;  %701 = vmatpush3.bf16.msra.mxu1 %v698_v26  ;;  %v285_v61 = vld [vmem:[#allocation7 + $0x70] sm:$0xff]  ;;  %v286_v62 = vld [vmem:[#allocation7 + $0x78] sm:$0xff] }
  0x48   :  { %675 = vmatprep.subr.bf16.mxu0 %v674_v21  ;;  %703 = vmatprep.subr.bf16.mxu1 %v702_v32  ;;  %v718_v63 = vpack.c.bf16 %v286_v62, %v285_v61 }
  0x4b   :  { %677 = vmatpush3.bf16.msra.mxu0 %v674_v21  ;;  %705 = vmatpush3.bf16.msra.mxu1 %v702_v32 }
  0x4c   :  { %679 = vmatprep.subr.bf16.mxu0 %v678_v27  ;;  %707 = vmatprep.subr.bf16.mxu1 %v706_v38 }
  0x4f   :  { %681 = vmatpush3.bf16.msra.mxu0 %v678_v27  ;;  %709 = vmatpush3.bf16.msra.mxu1 %v706_v38 }
  0x50   :  { %683 = vmatprep.subr.bf16.mxu0 %v682_v33  ;;  %711 = vmatprep.subr.bf16.mxu1 %v710_v42 }
  0x53   :  { %685 = vmatpush3.bf16.msra.mxu0 %v682_v33  ;;  %713 = vmatpush3.bf16.msra.mxu1 %v710_v42 }
  0x54   :  { %687 = vmatprep.subr.bf16.mxu0 %v686_v39  ;;  %715 = vmatprep.subr.bf16.mxu1 %v714_v46 }
  0x57   :  { %689 = vmatpush3.bf16.msra.mxu0 %v686_v39  ;;  %717 = vmatpush3.bf16.msra.mxu1 %v714_v46 }
  0x58   :  { %719 = vmatprep.subr.bf16.mxu1 %v718_v63 }
  0x5a   :  { %579 = vmatmul.mubr.f32.vlgmr.msra.gmra.mrb[0].mxu0 %v60_v45 }
  0x5b   :  { %581 = vmatprep.mubr.f32.mxu0 %v61_v47  ;;  %721 = vmatpush3.bf16.msra.mxu1 %v718_v63 }
  0x5e   :  { %582 = vmatmul.mubr.f32.gmra.mrb[2].mxu0 %v62_v48 }
  0x5f   :  { %584 = vmatprep.mubr.f32.mxu0 %v63_v49 }
  0x62   :  { %585 = vmatmul.mubr.f32.gmra.mrb[4].mxu0 %v64_v50 }
  0x63   :  { %587 = vmatprep.mubr.f32.mxu0 %v65_v51 }
  0x66   :  { %588 = vmatmul.mubr.f32.gmra.mrb[6].mxu0 %v66_v52 }
  0x67   :  { %590 = vmatprep.mubr.f32.mxu0 %v67_v53 }
  0x6a   :  { %591 = vmatmul.mubr.f32.gmra.mrb[8].mxu0 %v68_v54 }
  0x6b   :  { %593 = vmatprep.mubr.f32.mxu0 %v69_v55 }
  0x6e   :  { %594 = vmatmul.mubr.f32.gmra.mrb[10].mxu0 %v70_v56 }
  0x6f   :  { %596 = vmatprep.mubr.f32.mxu0 %v71_v57 }
  0x72   :  { %597 = vmatmul.mubr.f32.gmra.mrb[12].mxu0 %v72_v58 }
  0x73   :  { %599 = vmatprep.mubr.f32.mxu0 %v73_v59 }
  0x76   :  { %600 = vmatmul.mubr.f32.gmra.mrb[14].mxu0 %v74_v60 }
 0x12d   :  { %v580_v2 = vpop.f32.mrb[0].mxu0 }
 0x12e   :  { %v240_v3 = vsel %vm238_vm0, 1.0, %v580_v2  ;;  %v157_v4 = vpop.f32.mrb[1].mxu0 }
 0x12f   :  { %256 = vst [vmem:[#allocation8 + $0x8] sm:$0xff] %v240_v3  ;;  %v239_v5 = vsel %vm238_vm0, 1.0, %v157_v4 }
 0x130   :  { %255 = vst [vmem:[#allocation8] sm:$0xff] %v239_v5  ;;  %634 = vmatprep.mubr.f32.mxu1 %v239_v5 }
 0x131   :  { %v583_v6 = vpop.f32.mrb[2].mxu0  ;;  %635 = vmatmul.mubr.f32.vlgmr.msra.gmra.mrb[0].mxu1 %v240_v3 }
 0x132   :  { %v242_v7 = vsel %vm238_vm0, 1.0, %v583_v6  ;;  %v167_v8 = vpop.f32.mrb[3].mxu0 }
 0x133   :  { %258 = vst [vmem:[#allocation8 + $0x18] sm:$0xff] %v242_v7  ;;  %v241_v9 = vsel %vm238_vm0, 1.0, %v167_v8 }
 0x134   :  { %257 = vst [vmem:[#allocation8 + $0x10] sm:$0xff] %v241_v9  ;;  %637 = vmatprep.mubr.f32.mxu1 %v241_v9 }
 0x135   :  { %v586_v10 = vpop.f32.mrb[4].mxu0  ;;  %638 = vmatmul.mubr.f32.gmra.mrb[2].mxu1 %v242_v7 }
 0x136   :  { %v244_v11 = vsel %vm238_vm0, 1.0, %v586_v10  ;;  %v177_v12 = vpop.f32.mrb[5].mxu0 }
 0x137   :  { %260 = vst [vmem:[#allocation8 + $0x28] sm:$0xff] %v244_v11  ;;  %v243_v13 = vsel %vm238_vm0, 1.0, %v177_v12 }
 0x138   :  { %259 = vst [vmem:[#allocation8 + $0x20] sm:$0xff] %v243_v13  ;;  %640 = vmatprep.mubr.f32.mxu1 %v243_v13 }
 0x139   :  { %v589_v14 = vpop.f32.mrb[6].mxu0  ;;  %641 = vmatmul.mubr.f32.gmra.mrb[4].mxu1 %v244_v11 }
 0x13a   :  { %v246_v15 = vsel %vm238_vm0, 1.0, %v589_v14  ;;  %v187_v16 = vpop.f32.mrb[7].mxu0 }
 0x13b   :  { %262 = vst [vmem:[#allocation8 + $0x38] sm:$0xff] %v246_v15  ;;  %v245_v17 = vsel %vm238_vm0, 1.0, %v187_v16 }
 0x13c   :  { %261 = vst [vmem:[#allocation8 + $0x30] sm:$0xff] %v245_v17  ;;  %643 = vmatprep.mubr.f32.mxu1 %v245_v17 }
 0x13d   :  { %v592_v18 = vpop.f32.mrb[8].mxu0  ;;  %644 = vmatmul.mubr.f32.gmra.mrb[6].mxu1 %v246_v15 }
 0x13e   :  { %v248_v19 = vsel %vm238_vm0, 1.0, %v592_v18  ;;  %v197_v20 = vpop.f32.mrb[9].mxu0 }
 0x13f   :  { %264 = vst [vmem:[#allocation8 + $0x48] sm:$0xff] %v248_v19  ;;  %v247_v21 = vsel %vm238_vm0, 1.0, %v197_v20 }
 0x140   :  { %263 = vst [vmem:[#allocation8 + $0x40] sm:$0xff] %v247_v21  ;;  %646 = vmatprep.mubr.f32.mxu1 %v247_v21 }
 0x141   :  { %v595_v22 = vpop.f32.mrb[10].mxu0  ;;  %647 = vmatmul.mubr.f32.gmra.mrb[8].mxu1 %v248_v19 }
 0x142   :  { %v250_v23 = vsel %vm238_vm0, 1.0, %v595_v22  ;;  %v207_v24 = vpop.f32.mrb[11].mxu0 }
 0x143   :  { %266 = vst [vmem:[#allocation8 + $0x58] sm:$0xff] %v250_v23  ;;  %v249_v25 = vsel %vm238_vm0, 1.0, %v207_v24 }
 0x144   :  { %265 = vst [vmem:[#allocation8 + $0x50] sm:$0xff] %v249_v25  ;;  %649 = vmatprep.mubr.f32.mxu1 %v249_v25 }
 0x145   :  { %v598_v26 = vpop.f32.mrb[12].mxu0  ;;  %650 = vmatmul.mubr.f32.gmra.mrb[10].mxu1 %v250_v23 }
 0x146   :  { %v252_v27 = vsel %vm238_vm0, 1.0, %v598_v26  ;;  %v217_v28 = vpop.f32.mrb[13].mxu0 }
 0x147   :  { %268 = vst [vmem:[#allocation8 + $0x68] sm:$0xff] %v252_v27  ;;  %v251_v29 = vsel %vm238_vm0, 1.0, %v217_v28 }
 0x148   :  { %267 = vst [vmem:[#allocation8 + $0x60] sm:$0xff] %v251_v29  ;;  %652 = vmatprep.mubr.f32.mxu1 %v251_v29 }
 0x149   :  { %v601_v30 = vpop.f32.mrb[14].mxu0  ;;  %653 = vmatmul.mubr.f32.gmra.mrb[12].mxu1 %v252_v27 }
 0x14a   :  { %v254_v31 = vsel %vm238_vm0, 1.0, %v601_v30  ;;  %v227_v32 = vpop.f32.mrb[15].mxu0 }
 0x14b   :  { %270 = vst [vmem:[#allocation8 + $0x78] sm:$0xff] %v254_v31  ;;  %v253_v33 = vsel %vm238_vm0, 1.0, %v227_v32 }
 0x14c   :  { %269 = vst [vmem:[#allocation8 + $0x70] sm:$0xff] %v253_v33  ;;  %655 = vmatprep.mubr.f32.mxu1 %v253_v33 }
 0x14d   :  { %656 = vmatmul.mubr.f32.gmra.mrb[14].mxu1 %v254_v31 }
 0x14e   :  { %806 = shalt.err (!%p803_p0)
}
 0x14f   :  { %s807_s5 = scalar_lea.hbm %s999_s3, 2048 }
 0x150   :  { %p808_p1 = scmp.ne.s32.totalorder %s999_s3, %s807_s5  ;;  %p811_p2 = scmp.lt.u32.totalorder %s807_s5, %s999_s3 }
 0x152   :  { %p813_p3 = pnand %p811_p2, %p808_p1 }
 0x154   :  { %816 = shalt.err (!%p813_p3)
}
 0x155   :  { %459 = dma.vmem_to_hbm [thread:$0]  %s454_s25, 2048, %s999_s3, [#allocation4], %s849_s27, %s849_s27, %s850_s28  }
 0x156   :  { %s853_s3 = smov [#allocation9]  }
 0x157   :  { %s465_s12 = sshll.u32 %s853_s3, 4  ;;  %s466_s12 = int_to_ptr.vmem [resolvable:$true] %s465_s12 }
 0x158   :  { %s817_s1 = scalar_lea.vmem %s466_s12, 2048  ;;  %p822_p5 = scmp.lt.s32.totalorder %s466_s12, %s466_s12 }
 0x159   :  { %p818_p4 = scmp.ne.s32.totalorder %s466_s12, %s817_s1  ;;  %p823_p6 = scmp.lt.s32.totalorder %s817_s1, %s817_s1 }
 0x15b   :  { %p824_p7 = por %p823_p6, %p822_p5 }
 0x15d   :  { %p825_p8 = pnand %p824_p7, %p818_p4 }
 0x204   :  { %v636_v34 = vpop.f32.mrb[0].mxu1 }
 0x205   :  { %433 = vst [vmem:[#allocation9 + $0x8] sm:$0xff] %v636_v34  ;;  %v353_v35 = vpop.f32.mrb[1].mxu1 }
 0x206   :  { %432 = vst [vmem:[#allocation9] sm:$0xff] %v353_v35 }
 0x208   :  { %v639_v36 = vpop.f32.mrb[2].mxu1 }
 0x209   :  { %435 = vst [vmem:[#allocation9 + $0x18] sm:$0xff] %v639_v36  ;;  %v363_v37 = vpop.f32.mrb[3].mxu1 }
 0x20a   :  { %434 = vst [vmem:[#allocation9 + $0x10] sm:$0xff] %v363_v37 }
 0x20c   :  { %v642_v38 = vpop.f32.mrb[4].mxu1 }
 0x20d   :  { %437 = vst [vmem:[#allocation9 + $0x28] sm:$0xff] %v642_v38  ;;  %v373_v39 = vpop.f32.mrb[5].mxu1 }
 0x20e   :  { %436 = vst [vmem:[#allocation9 + $0x20] sm:$0xff] %v373_v39 }
 0x210   :  { %v645_v40 = vpop.f32.mrb[6].mxu1 }
 0x211   :  { %439 = vst [vmem:[#allocation9 + $0x38] sm:$0xff] %v645_v40  ;;  %v383_v41 = vpop.f32.mrb[7].mxu1 }
 0x212   :  { %438 = vst [vmem:[#allocation9 + $0x30] sm:$0xff] %v383_v41 }
 0x214   :  { %v648_v42 = vpop.f32.mrb[8].mxu1 }
 0x215   :  { %441 = vst [vmem:[#allocation9 + $0x48] sm:$0xff] %v648_v42  ;;  %v393_v43 = vpop.f32.mrb[9].mxu1 }
 0x216   :  { %440 = vst [vmem:[#allocation9 + $0x40] sm:$0xff] %v393_v43 }
 0x218   :  { %v651_v44 = vpop.f32.mrb[10].mxu1 }
 0x219   :  { %443 = vst [vmem:[#allocation9 + $0x58] sm:$0xff] %v651_v44  ;;  %v403_v45 = vpop.f32.mrb[11].mxu1 }
 0x21a   :  { %442 = vst [vmem:[#allocation9 + $0x50] sm:$0xff] %v403_v45 }
 0x21c   :  { %v654_v46 = vpop.f32.mrb[12].mxu1 }
 0x21d   :  { %445 = vst [vmem:[#allocation9 + $0x68] sm:$0xff] %v654_v46  ;;  %v413_v47 = vpop.f32.mrb[13].mxu1 }
 0x21e   :  { %444 = vst [vmem:[#allocation9 + $0x60] sm:$0xff] %v413_v47 }
 0x220   :  { %v657_v48 = vpop.f32.mrb[14].mxu1 }
 0x221   :  { %447 = vst [vmem:[#allocation9 + $0x78] sm:$0xff] %v657_v48  ;;  %v423_v49 = vpop.f32.mrb[15].mxu1 }
 0x222   :  { %446 = vst [vmem:[#allocation9 + $0x70] sm:$0xff] %v423_v49 }
 0x223   :  { %828 = shalt.err (!%p825_p8)
}
 0x224   :  { %s829_s15 = scalar_lea.hbm %s1000_s4, 2048 }
 0x225   :  { %p830_p9 = scmp.ne.s32.totalorder %s1000_s4, %s829_s15  ;;  %p833_p10 = scmp.lt.u32.totalorder %s829_s15, %s1000_s4 }
 0x227   :  { %p835_p11 = pnand %p833_p10, %p830_p9 }
 0x229   :  { %838 = shalt.err (!%p835_p11)
}
 0x22a   :  { %471 = dma.vmem_to_hbm [thread:$0]  %s466_s12, 2048, %s1000_s4, [#allocation10], %s849_s27, %s849_s27, %s850_s28  }
 0x22b   :  { %843 = dma.done.wait [#allocation4], 2048  }
 0x22c   :  { %844 = vsyncadd [#allocation4], 4294965248 }
 0x22d   :  { %845 = dma.done.wait [#allocation10], 2048  }
 0x22e   :  { %846 = vsyncadd [#allocation10], 4294965248 }
 0x22f   :  { %478 = vsyncpa [#allocation3], 1 }
 0x230   :  { %479 = vsyncpa [#allocation6], 1 }
 0x231   :  { %480 = vsyncpa [#allocation4], 1 }
 0x232   :  { %481 = vsyncpa [#allocation10], 1 }

</bundles_post_ra>
